<compile_context>
chip_gen: v7x
topology: tpu7x:2x2x1
jax: 0.10.0
libtpu: 0.0.40
codegen_flags: <defaults>
</compile_context>

<pallas_src>
import math
import functools

import jax
import jax.numpy as jnp
from jax import lax
from jax.experimental import pallas as pl
from jax.experimental.pallas import tpu as pltpu


def _round_up(x, m):
    return (int(x) + int(m) - 1) // int(m) * int(m)


def _vmem_capacity_bytes():
    """Generation-aware VMEM capacity (per TensorCore), with a conservative fallback."""
    try:
        return int(pltpu.get_tpu_info().vmem_capacity_bytes)
    except Exception:
        return 64 * 1024 * 1024  # v7x per-TC size: safe lower bound on all gens


# --------------------------------------------------------------------------------------
# Kernel
# --------------------------------------------------------------------------------------
def _arc_margin_kernel(xn_ref, wt_ref, label_ref, out_ref, *,
                       s, cos_m, sin_m, th, mm, easy_margin, ls_eps,
                       out_features, tile_c, training):
    # xn_ref    : (TILE_B, D_pad)   matmul dtype — pre-normalized x (resident over class axis)
    # wt_ref    : (D_pad, TILE_C)   matmul dtype — pre-normalized, pre-transposed W tile (streamed)
    # label_ref : (TILE_B, 1)       int32        — resident over class axis
    # out_ref   : (TILE_B, TILE_C)  float32
    cosine = jnp.dot(xn_ref[...], wt_ref[...],
                     preferred_element_type=jnp.float32)          # (TILE_B, TILE_C), f32

    if not training:
        # Eval path of the PyTorch module: raw cosine, no margin, no scale.
        out_ref[...] = cosine
        return

    # Clamp 1 - cos^2 at 0 to avoid NaN from fp rounding near |cos| = 1.
    sine = jnp.sqrt(jnp.maximum(1.0 - cosine * cosine, 0.0))
    phi = cosine * cos_m - sine * sin_m
    if easy_margin:
        phi = jnp.where(cosine > 0.0, phi, cosine)
    else:
        phi = jnp.where(cosine > th, phi, cosine - mm)

    # one-hot against the GLOBAL class index of this tile (class axis = grid axis 1).
    Bt, Ct = cosine.shape
    col0 = pl.program_id(1) * tile_c
    col_ids = col0 + lax.broadcasted_iota(jnp.int32, (Bt, Ct), 1)
    is_target = col_ids == label_ref[...]                          # (Bt, Ct) bool

    if ls_eps > 0.0:
        # Fold label-smoothing constants at trace time; use cosine + oh*(phi - cosine).
        off = float(ls_eps) / float(out_features)
        on = (1.0 - float(ls_eps)) + off
        one_hot = jnp.where(is_target, on, off)
        out_ref[...] = (cosine + one_hot * (phi - cosine)) * s
    else:
        # Trimmed epilogue: single select, single scale multiply.
        out_ref[...] = jnp.where(is_target, phi, cosine) * s


# --------------------------------------------------------------------------------------
# Module wrapper
# --------------------------------------------------------------------------------------
class ArcMarginProductPallas:
    """JAX/Pallas port of the PyTorch ArcMarginProduct module (forward pass)."""

    def __init__(self, in_features, out_features, s=30.0, m=0.5,
                 easy_margin=False, ls_eps=0.0, key=None,
                 tile_c=None, tile_b=256,
                 matmul_dtype=jnp.bfloat16,        # bf16 default: HBM-bound weight stream
                 dimension_semantics=None,         # e.g. (pltpu.CORE_PARALLEL, "arbitrary") on v7x
                 w_buffers=2):                     # >2 only if profiling shows exposed DMA waits
        self.in_features = int(in_features)
        self.out_features = int(out_features)
        self.s = float(s)
        self.m = float(m)
        self.easy_margin = bool(easy_margin)
        self.ls_eps = float(ls_eps)
        self.cos_m = math.cos(m)
        self.sin_m = math.sin(m)
        self.th = math.cos(math.pi - m)
        self.mm = math.sin(math.pi - m) * m
        self.training = True
        self.tile_c = tile_c
        self.tile_b = int(tile_b)
        self.matmul_dtype = matmul_dtype
        self.dimension_semantics = dimension_semantics
        self.w_buffers = int(w_buffers)
        self._fwd_cache = {}

        # xavier_uniform_ on (out_features, in_features)
        if key is None:
            key = jax.random.PRNGKey(0)
        bound = math.sqrt(6.0 / (in_features + out_features))
        self.weight = jax.random.uniform(
            key, (out_features, in_features), dtype=jnp.float32,
            minval=-bound, maxval=bound)

    # ----- tiling policy ---------------------------------------------------
    def _choose_tile_c(self, tile_b, d_pad, c_lane, vmem_cap):
        if self.tile_c is not None:
            return int(min(_round_up(self.tile_c, 128), c_lane))
        elt = jnp.dtype(self.matmul_dtype).itemsize
        # Budget ~60% of physical VMEM for pallas buffers; the rest is compiler
        # scratch / semaphores / headroom.
        budget = int(vmem_cap * 0.6)
        resident = tile_b * d_pad * elt + tile_b * 4                # x tile + labels
        avail = max(0, budget - resident)
        # Per unit of tile_c: W n-buffer + f32 output double-buffer.
        nbuf = max(2, self.w_buffers)
        per_col = nbuf * d_pad * elt + 2 * tile_b * 4
        tc = max(128, (avail // max(1, per_col)) // 128 * 128)
        return int(min(tc, c_lane))

    # ----- forward builder --------------------------------------------------
    def _make_forward(self, B, D, training):
        C = self.out_features
        mm_dtype = self.matmul_dtype

        # Static tiling / padding decisions.
        d_pad = _round_up(max(D, 1), 128)                   # full-lane K dim
        tile_b = min(_round_up(self.tile_b, 8), _round_up(B, 8))
        b_pad = _round_up(B, tile_b)
        c_lane = _round_up(C, 128)

        vmem_cap = _vmem_capacity_bytes()
        tile_c = self._choose_tile_c(tile_b, d_pad, c_lane, vmem_cap)
        c_pad = _round_up(c_lane, tile_c)
        n_b = b_pad // tile_b
        n_c = c_pad // tile_c

        # ~75% of physical VMEM (≈48 MiB v7x, ≈96 MiB v5e/v6e), floor 32 MiB.
        vmem_limit = max(32 * 1024 * 1024,
                         min(int(vmem_cap * 0.75), 100 * 1024 * 1024))

        dims = self.dimension_semantics
        if dims is None:
            dims = ("parallel", "parallel")                 # independent output tiles

        kernel = functools.partial(
            _arc_margin_kernel,
            s=self.s, cos_m=self.cos_m, sin_m=self.sin_m,
            th=self.th, mm=self.mm,
            easy_margin=self.easy_margin, ls_eps=self.ls_eps,
            out_features=C, tile_c=tile_c, training=training,
        )

        w_spec_kwargs = {}
        if self.w_buffers > 2:
            # Deeper W pipeline only when profiling shows exposed DMA at tile edges.
            w_spec_kwargs["pipeline_mode"] = pl.Buffered(self.w_buffers)

        call = pl.pallas_call(
            kernel,
            out_shape=jax.ShapeDtypeStruct((b_pad, c_pad), jnp.float32),
            grid=(n_b, n_c),                                 # class axis innermost
            in_specs=[
                pl.BlockSpec((tile_b, d_pad), lambda i, j: (i, 0)),   # x_n   (resident over j)
                pl.BlockSpec((d_pad, tile_c), lambda i, j: (0, j),    # W_n^T (streamed)
                             **w_spec_kwargs),
                pl.BlockSpec((tile_b, 1), lambda i, j: (i, 0)),       # labels (resident over j)
            ],
            out_specs=pl.BlockSpec((tile_b, tile_c), lambda i, j: (i, j)),
            compiler_params=pltpu.CompilerParams(
                dimension_semantics=dims,
                vmem_limit_bytes=vmem_limit,
            ),
        )

        def forward(weight, x, label):
            # ---- weight: normalize rows -> transpose -> cast -> pad (one fused jit region,
            #      cast BEFORE pad so the pad moves half the bytes in bf16).
            w = weight.astype(jnp.float32)
            w_n = w * lax.rsqrt(jnp.maximum(jnp.sum(w * w, axis=1, keepdims=True), 1e-24))
            wt = w_n.T.astype(mm_dtype)                                   # (D, C)
            wt = jnp.pad(wt, ((0, d_pad - D), (0, c_pad - C)))

            # ---- x: row-normalization hoisted out of the kernel (done once per call).
            xf = x.astype(jnp.float32)
            x_n = xf * lax.rsqrt(jnp.maximum(jnp.sum(xf * xf, axis=1, keepdims=True), 1e-24))
            x_n = jnp.pad(x_n.astype(mm_dtype), ((0, b_pad - B), (0, d_pad - D)))

            lab = jnp.pad(label.reshape(B, 1).astype(jnp.int32), ((0, b_pad - B), (0, 0)))

            out = call(x_n, wt, lab)
            return out[:B, :C]

        return forward

    # ----- forward ----------------------------------------------------------
    def __call__(self, x, label):
        B, D = x.shape
        assert D == self.in_features
        key = (int(B), int(D), bool(self.training))
        fwd = self._fwd_cache.get(key)
        if fwd is None:
            fwd = jax.jit(self._make_forward(B, D, bool(self.training)))
            self._fwd_cache[key] = fwd
        return fwd(self.weight, x, label)


# --------------------------------------------------------------------------------------
# Pure-JAX reference (same 1 - cos^2 clamp as the kernel)
# --------------------------------------------------------------------------------------
def _reference(x, w, label, mod):
    x_n = x / jnp.maximum(jnp.linalg.norm(x, axis=1, keepdims=True), 1e-12)
    w_n = w / jnp.maximum(jnp.linalg.norm(w, axis=1, keepdims=True), 1e-12)
    cosine = x_n @ w_n.T
    sine = jnp.sqrt(jnp.maximum(1.0 - cosine ** 2, 0.0))
    phi = cosine * mod.cos_m - sine * mod.sin_m
    if mod.easy_margin:
        phi = jnp.where(cosine > 0.0, phi, cosine)
    else:
        phi = jnp.where(cosine > mod.th, phi, cosine - mod.mm)
    one_hot = jax.nn.one_hot(label, mod.out_features, dtype=jnp.float32)
    if mod.ls_eps > 0.0:
        one_hot = (1.0 - mod.ls_eps) * one_hot + mod.ls_eps / mod.out_features
    return (one_hot * phi + (1.0 - one_hot) * cosine) * mod.s


if __name__ == "__main__":
    key = jax.random.PRNGKey(0)
    k_w, k_x, k_l = jax.random.split(key, 3)

    # Small demo shapes; tile_c=128 forces a 4-step class grid so the global
    # column-offset / multi-tile path is exercised; D=64 exercises D-padding to 128.
    B, in_features, out_features = 8, 64, 512
    x = jax.random.normal(k_x, (B, in_features), dtype=jnp.float32)
    label = jax.random.randint(k_l, (B,), 0, out_features, dtype=jnp.int32)

    # 1) Default (bf16 weight/x stream) module — production configuration.
    mod_bf16 = ArcMarginProductPallas(in_features, out_features, s=30.0, m=0.5,
                                      easy_margin=False, ls_eps=0.0,
                                      key=k_w, tile_c=128)
    out_bf16 = jax.block_until_ready(mod_bf16(x, label))
    ref = _reference(x, mod_bf16.weight, label, mod_bf16)
    assert out_bf16.shape == (B, out_features)
    assert bool(jnp.all(jnp.isfinite(out_bf16))), "non-finite output (bf16)"
    assert jnp.allclose(out_bf16, ref, atol=3e-1, rtol=3e-2), "bf16 mismatch vs reference"

    # 2) f32 matmul dtype — tight parity with the f32 reference.
    mod_f32 = ArcMarginProductPallas(in_features, out_features, s=30.0, m=0.5,
                                     easy_margin=False, ls_eps=0.0,
                                     key=k_w, tile_c=128, matmul_dtype=jnp.float32)
    out_f32 = jax.block_until_ready(mod_f32(x, label))
    assert jnp.allclose(out_f32, ref, atol=5e-4, rtol=5e-4), "f32 mismatch vs reference"

    # 3) Label smoothing path.
    mod_ls = ArcMarginProductPallas(in_features, out_features, s=30.0, m=0.5,
                                    easy_margin=False, ls_eps=0.1,
                                    key=k_w, tile_c=128, matmul_dtype=jnp.float32)
    out_ls = jax.block_until_ready(mod_ls(x, label))
    ref_ls = _reference(x, mod_ls.weight, label, mod_ls)
    assert jnp.allclose(out_ls, ref_ls, atol=5e-4, rtol=5e-4), "ls_eps mismatch vs reference"

    # 4) Eval-mode path (raw cosine, as in the PyTorch module).
    mod_f32.training = False
    out_eval = jax.block_until_ready(mod_f32(x, label))
    x_n = x / jnp.maximum(jnp.linalg.norm(x, axis=1, keepdims=True), 1e-12)
    w_n = mod_f32.weight / jnp.maximum(
        jnp.linalg.norm(mod_f32.weight, axis=1, keepdims=True), 1e-12)
    assert jnp.allclose(out_eval, x_n @ w_n.T, atol=5e-4, rtol=5e-4), "eval mismatch"

    print("KERNEL_OK")
</pallas_src>

<mosaic_0001>
module attributes {stable_mosaic.version = 11 : i64} {
  func.func @_arc_margin_kernel(%arg0: i32, %arg1: i32, %arg2: memref<8x128xbf16, #tpu.memory_space<vmem>>, %arg3: memref<128x128xbf16, #tpu.memory_space<vmem>>, %arg4: memref<8x1xi32, #tpu.memory_space<vmem>>, %arg5: memref<8x128xf32, #tpu.memory_space<vmem>>) attributes {dimension_semantics = [#tpu.dimension_semantics<parallel>, #tpu.dimension_semantics<parallel>], iteration_bounds = array<i64: 1, 4>, scalar_prefetch = 0 : i64, scratch_operands = 0 : i64, tpu.core_type = #tpu.core_type<tc>, window_params = [{transform_indices = @transform_0, window_bounds = array<i64: 8, 128>}, {transform_indices = @transform_1, window_bounds = array<i64: 128, 128>}, {transform_indices = @transform_2, window_bounds = array<i64: 8, 1>}, {transform_indices = @transform_3, window_bounds = array<i64: 8, 128>}]} {
    %c0 = arith.constant 0 : index
    %c0_0 = arith.constant 0 : index
    %0 = vector.load %arg2[%c0, %c0_0] : memref<8x128xbf16, #tpu.memory_space<vmem>>, vector<8x128xbf16>
    %c0_1 = arith.constant 0 : index
    %c0_2 = arith.constant 0 : index
    %1 = vector.load %arg3[%c0_1, %c0_2] : memref<128x128xbf16, #tpu.memory_space<vmem>>, vector<128x128xbf16>
    %cst = arith.constant dense<0.000000e+00> : vector<8x128xf32>
    %2 = tpu.matmul %0, %1, %cst {dimension_numbers = #tpu.dot_dimension_numbers<[1], [0], [0], [1], [0, 0, 1, 1], [], []>} : vector<8x128xbf16>, vector<128x128xbf16>, vector<8x128xf32> -> vector<8x128xf32>
    %3 = arith.mulf %2, %2 : vector<8x128xf32>
    %cst_3 = arith.constant 1.000000e+00 : f32
    %4 = vector.broadcast %cst_3 : f32 to vector<8x128xf32>
    %5 = arith.subf %4, %3 : vector<8x128xf32>
    %cst_4 = arith.constant 0.000000e+00 : f32
    %6 = vector.broadcast %cst_4 : f32 to vector<8x128xf32>
    %7 = arith.maximumf %5, %6 : vector<8x128xf32>
    %8 = math.sqrt %7 : vector<8x128xf32>
    %cst_5 = arith.constant 0.87758255 : f32
    %9 = vector.broadcast %cst_5 : f32 to vector<8x128xf32>
    %10 = arith.mulf %2, %9 : vector<8x128xf32>
    %cst_6 = arith.constant 0.47942555 : f32
    %11 = vector.broadcast %cst_6 : f32 to vector<8x128xf32>
    %12 = arith.mulf %8, %11 : vector<8x128xf32>
    %13 = arith.subf %10, %12 : vector<8x128xf32>
    %cst_7 = arith.constant -0.87758255 : f32
    %14 = vector.broadcast %cst_7 : f32 to vector<8x128xf32>
    %15 = arith.cmpf ogt, %2, %14 : vector<8x128xf32>
    %cst_8 = arith.constant 0.239712775 : f32
    %16 = vector.broadcast %cst_8 : f32 to vector<8x128xf32>
    %17 = arith.subf %2, %16 : vector<8x128xf32>
    %18 = arith.select %15, %13, %17 : vector<8x128xi1>, vector<8x128xf32>
    %c128_i32 = arith.constant 128 : i32
    %19 = arith.muli %arg1, %c128_i32 : i32
    %20 = tpu.iota {dimensions = array<i32: 1>} : vector<8x128xi32>
    %21 = vector.broadcast %19 : i32 to vector<8x128xi32>
    %22 = arith.addi %21, %20 : vector<8x128xi32>
    %c0_9 = arith.constant 0 : index
    %c0_10 = arith.constant 0 : index
    %23 = vector.load %arg4[%c0_9, %c0_10] : memref<8x1xi32, #tpu.memory_space<vmem>>, vector<8x1xi32>
    %24 = vector.broadcast %23 : vector<8x1xi32> to vector<8x128xi32>
    %25 = arith.cmpi eq, %22, %24 : vector<8x128xi32>
    %26 = arith.select %25, %18, %2 : vector<8x128xi1>, vector<8x128xf32>
    %cst_11 = arith.constant 3.000000e+01 : f32
    %27 = vector.broadcast %cst_11 : f32 to vector<8x128xf32>
    %28 = arith.mulf %26, %27 : vector<8x128xf32>
    %c0_12 = arith.constant 0 : index
    %c0_13 = arith.constant 0 : index
    %29 = vector.load %arg5[%c0_12, %c0_13] : memref<8x128xf32, #tpu.memory_space<vmem>>, vector<8x128xf32>
    tpu.vector_store %arg5[%c0_12, %c0_13], %28 {strides = array<i32>} : memref<8x128xf32, #tpu.memory_space<vmem>>, vector<8x128xf32>,
    return
  }
  func.func @transform_0(%arg0: i32, %arg1: i32) -> (i32, i32) {
    %c0_i32 = arith.constant 0 : i32
    %c0_i32_0 = arith.constant 0 : i32
    return %arg0, %c0_i32 : i32, i32
  }
  func.func @transform_1(%arg0: i32, %arg1: i32) -> (i32, i32) {
    %c0_i32 = arith.constant 0 : i32
    %c0_i32_0 = arith.constant 0 : i32
    return %c0_i32, %arg1 : i32, i32
  }
  func.func @transform_2(%arg0: i32, %arg1: i32) -> (i32, i32) {
    %c0_i32 = arith.constant 0 : i32
    %c0_i32_0 = arith.constant 0 : i32
    return %arg0, %c0_i32 : i32, i32
  }
  func.func @transform_3(%arg0: i32, %arg1: i32) -> (i32, i32) {
    %c0_i32 = arith.constant 0 : i32
    return %arg0, %arg1 : i32, i32
  }
}

</mosaic_0001>

<bundles_post_ra>
// kernel: forward.1
= control target key start
LH: loop header
LB: loop body
LE: loop exit
PB: predicated region body
PF: predicated region fallthrough
CT: control target
= control target key end

     0   :  { %8 = vsyncpa [#allocation4], 0  ;;  %s944_s0 = inlined_call_operand.vmem [shape: bf16[8,128], index: 0, kind: input, shape index: {}]   ;;  %s945_s1 = inlined_call_operand.vmem [shape: bf16[128,512], index: 1, kind: input, shape index: {}]   ;;  %s946_s2 = inlined_call_operand.vmem [shape: s32[8,1], index: 2, kind: input, shape index: {}]   ;;  %s947_s3 = inlined_call_operand.hbm [shape: f32[8,512], index: 3, kind: output, shape index: {}]  }
   0x1   :  { %10 = vsyncpa [#allocation4 + $0x1], 0  ;;  %s801_s12 = smov 0   ;;  %s803_s13 = smov 0  }
   0x2   :  { %s805_s14 = smov 0   ;;  %s807_s15 = smov 0  }
   0x3   :  { %s809_s16 = smov 0   ;;  %s811_s17 = smov 0  }
   0x4 LB: > { %s574_s18 = sadd.s32 4294967295, %s775_s17   ;;  %s575_s19 = sadd.s32 4294967294, %s775_s17   ;;  %s775_s17 = sphi %s811_s17, %s16_s17   ;;  %s771_s16 = sphi %s809_s16, %s954_s16   ;;  %s767_s15 = sphi %s807_s15, %s953_s15   ;;  %s763_s14 = sphi %s805_s14, %s952_s14   ;;  %s759_s13 = sphi %s803_s13, %s951_s13   ;;  %s755_s12 = sphi %s801_s12, %s950_s12  }
   0x5   : > { %s25_s20 = sadd.s32 1, %s771_s16  ;;  %s61_s21 = sadd.s32 1, %s763_s14 }
   0x6   : > { %p26_p0 = scmp.ge.s32.totalorder %s25_s20, 4  ;;  %p68_p1 = scmp.ne.s32.totalorder %s763_s14, %s759_s13 }
   0x7   : > { %p69_p2 = scmp.eq.s32.totalorder %s775_s17, 0  ;;  %p126_p3 = scmp.eq.s32.totalorder %s574_s18, 3 }
   0x8   : > { %s956_s20 = smov (%p26_p0, %s25_s20), 0  ;;  %p131_p6 = scmp.ne.s32.totalorder %s759_s13, %s755_s12 }
   0x9   : > { %p70_p4 = por %p69_p2, %p68_p1  ;;  %p840_p5 = por %p126_p3, %p68_p1 }
   0xa   : > { %s58_s23 = ssub.s32 %s771_s16, %s956_s20  ;;  %p132_p8 = scmp.eq.s32.totalorder %s575_s19, 3 }
   0xb   : > { %p59_p7 = scmp.eq.s32.totalorder %s58_s23, 0  ;;  %p579_p10 = scmp.ge.s32.totalorder %s775_s17, 4 }
   0xc   : > { %p851_p9 = por %p132_p8, %p131_p6 }
   0xd   : > { %s849_s24 = scalar_select %p59_p7, %s763_s14, %s61_s21  }
   0xe   : > { %162 = sbr.rel (%p579_p10) target bundleno = 36 (0x24), region = 24 }
  0x15   : > { %165 = sbr.rel (!%p70_p4) target bundleno = 36 (0x24), region = 28  ;;  %s167_s26 = sand.u32 (%p70_p4), 1, %s763_s14  }
  0x16   : > { %s581_s27 = sshll.u32 (%p70_p4), %s771_s16, 2  ;;  %s580_s28 = sshll.u32 (%p70_p4), %s167_s26, 6 }
  0x17   : > { %s861_s4 = scalar_lea.vmem (%p70_p4), %s945_s1, %s581_s27  ;;  %s169_s5 = scalar_lea.vmem (%p70_p4), [#allocation2], %s580_s28 }
  0x18   : > { %v187_v0 = vld [vmem:[%s861_s4] sm:$0xf] (%p70_p4)  ;;  %v189_v1 = vld [vmem:[%s861_s4 + $0x10] sm:$0xf] (%p70_p4) }
  0x19   : > { %188 = vst [vmem:[%s169_s5] sm:$0xf] (%p70_p4), %v187_v0  ;;  %190 = vst [vmem:[%s169_s5 + $0x4] sm:$0xf] (%p70_p4), %v189_v1  ;;  %v191_v2 = vld [vmem:[%s861_s4 + $0x20] sm:$0xf] (%p70_p4) }
  0x1a   : > { %v193_v3 = vld [vmem:[%s861_s4 + $0x30] sm:$0xf] (%p70_p4)  ;;  %v195_v4 = vld [vmem:[%s861_s4 + $0x40] sm:$0xf] (%p70_p4)  ;;  %192 = vst [vmem:[%s169_s5 + $0x8] sm:$0xf] (%p70_p4), %v191_v2 }
  0x1b   : > { %194 = vst [vmem:[%s169_s5 + $0xc] sm:$0xf] (%p70_p4), %v193_v3  ;;  %196 = vst [vmem:[%s169_s5 + $0x10] sm:$0xf] (%p70_p4), %v195_v4  ;;  %v197_v5 = vld [vmem:[%s861_s4 + $0x50] sm:$0xf] (%p70_p4) }
  0x1c   : > { %v199_v6 = vld [vmem:[%s861_s4 + $0x60] sm:$0xf]  ;;  %v201_v7 = vld [vmem:[%s861_s4 + $0x70] sm:$0xf]  ;;  %198 = vst [vmem:[%s169_s5 + $0x14] sm:$0xf] %v197_v5 }
  0x1d   : > { %200 = vst [vmem:[%s169_s5 + $0x18] sm:$0xf] %v199_v6  ;;  %202 = vst [vmem:[%s169_s5 + $0x1c] sm:$0xf] %v201_v7  ;;  %v203_v8 = vld [vmem:[%s861_s4 + $0x80] sm:$0xf] }
  0x1e   : > { %v205_v9 = vld [vmem:[%s861_s4 + $0x90] sm:$0xf]  ;;  %v207_v10 = vld [vmem:[%s861_s4 + $0xa0] sm:$0xf]  ;;  %204 = vst [vmem:[%s169_s5 + $0x20] sm:$0xf] %v203_v8 }
  0x1f   : > { %206 = vst [vmem:[%s169_s5 + $0x24] sm:$0xf] %v205_v9  ;;  %208 = vst [vmem:[%s169_s5 + $0x28] sm:$0xf] %v207_v10  ;;  %v209_v11 = vld [vmem:[%s861_s4 + $0xb0] sm:$0xf] }
  0x20   : > { %v211_v12 = vld [vmem:[%s861_s4 + $0xc0] sm:$0xf]  ;;  %v213_v13 = vld [vmem:[%s861_s4 + $0xd0] sm:$0xf]  ;;  %210 = vst [vmem:[%s169_s5 + $0x2c] sm:$0xf] %v209_v11 }
  0x21   : > { %212 = vst [vmem:[%s169_s5 + $0x30] sm:$0xf] %v211_v12  ;;  %214 = vst [vmem:[%s169_s5 + $0x34] sm:$0xf] %v213_v13  ;;  %v215_v14 = vld [vmem:[%s861_s4 + $0xe0] sm:$0xf] }
  0x22   : > { %v217_v15 = vld [vmem:[%s861_s4 + $0xf0] sm:$0xf]  ;;  %216 = vst [vmem:[%s169_s5 + $0x38] sm:$0xf] %v215_v14 }
  0x23   : > { %218 = vst [vmem:[%s169_s5 + $0x3c] sm:$0xf] %v217_v15 }
  0x24 PF: > { %p582_p11 = scmp.ge.s32.totalorder %s775_s17, 1  ;;  %p272_p12 = scmp.lt.s32.totalorder %s775_s17, 5 }
  0x26   : > { %p273_p13 = pnand %p582_p11, %p272_p12 }
  0x27   : > { %s882_s6 = sand.u32 (!%p273_p13), 1, %s759_s13   ;;  %v777_v16 = vmov (!%p273_p13), 0.0   ;;  %vm778_vm0 = vmmov (!%p273_p13), 0   ;;  %v445_v17 = vld [vmem:[%s946_s2] sm:$0xff] (!%p273_p13)  ;;  %v779_v18 = vmov (!%p273_p13), 0   ;;  %v441_v35 = vlaneseq (!%p273_p13)  ;;  %s594_s19 = sshll.u32 (!%p273_p13), %s767_s15, 7 }
  0x28   : > { %276 = sbr.rel (%p273_p13) target bundleno = 329 (0x149), region = 69  ;;  %608 = vmatprep.subr.bf16.mxu0 (!%p273_p13), %v777_v16  ;;  %s583_s7 = sshll.u32 (!%p273_p13), %s882_s6, 6  ;;  %624 = vmatprep.mubr.msk.bf16.mxu0 (!%p273_p13), %vm778_vm0, %v777_v16  ;;  %v319_v27 = vld [vmem:[%s944_s0] sm:$0xf] (!%p273_p13)  ;;  %v443_v38 = vstv (!%p273_p13), %s594_s19 }
  0x29   : > { %686 = vset.pattern.permute.xlu0 (!%p273_p13), %v779_v18  ;;  %s281_s10 = scalar_lea.vmem (!%p273_p13), [#allocation2], %s583_s7  ;;  %v442_v36 = vand.u32 (!%p273_p13), 127, %v441_v35  ;;  %s584_s21 = sshll.u32 (!%p273_p13), %s882_s6, 3 }
  0x2a   : > { %v687_v19 = vld [vmem:[%s281_s10] sm:$0xff] (!%p273_p13)   ;;  %447 = vperm.xlu0 (!%p273_p13), %686, %v445_v17   ;;  %v688_v20 = vld [vmem:[%s281_s10 + $0x8] sm:$0xff] (!%p273_p13)   ;;  %v689_v21 = vld [vmem:[%s281_s10 + $0x10] sm:$0xff] (!%p273_p13)   ;;  %s309_s15 = scalar_lea.vmem (!%p273_p13), [#allocation3], %s584_s21  ;;  %s896_s28 = scalar_lea.hbm (!%p273_p13), %s947_s3, %s594_s19 }
  0x2b   : > { %609 = vmatpush3.bf16.msra.mxu0 (!%p273_p13), %v687_v19  ;;  %v690_v22 = vld [vmem:[%s281_s10 + $0x18] sm:$0xff] (!%p273_p13)   ;;  %v691_v23 = vld [vmem:[%s281_s10 + $0x20] sm:$0xff] (!%p273_p13)   ;;  %v692_v24 = vld [vmem:[%s281_s10 + $0x28] sm:$0xff] (!%p273_p13)   ;;  %v444_v42 = vadd.s32 (!%p273_p13), %v443_v38, %v442_v36  ;;  %s469_s23 = sshll.u32 (!%p273_p13), %s309_s15, 4  ;;  %s454_s29 = scalar_lea.sflag (!%p273_p13), [#allocation4], %s882_s6  ;;  %s898_s23 = int_to_ptr.vmem [resolvable:$true] %s469_s23 }
  0x2c   : > { %610 = vmatprep.subr.bf16.mxu0 (!%p273_p13), %v777_v16  ;;  %v693_v25 = vld [vmem:[%s281_s10 + $0x30] sm:$0xff] (!%p273_p13)   ;;  %v694_v26 = vld [vmem:[%s281_s10 + $0x38] sm:$0xff] (!%p273_p13)   ;;  %s697_s30 = scalar_lea.vmem (!%p273_p13), %s898_s23, 128  ;;  %s780_s4 = smov (!%p273_p13), [#allocation3]  }
  0x2d   : > { %p698_p0 = scmp.ne.s32.totalorder (!%p273_p13), %s898_s23, %s697_s30  ;;  %s701_s5 = sshll.u32 (!%p273_p13), %s780_s4, 4  ;;  %s702_s5 = int_to_ptr.vmem [resolvable:$false] %s701_s5 }
  0x2e   : > { %s703_s7 = scalar_lea.vmem (!%p273_p13), %s702_s5, 256  ;;  %p704_p3 = scmp.lt.s32.totalorder (!%p273_p13), %s898_s23, %s702_s5 }
  0x2f   : > { %611 = vmatpush3.bf16.msra.mxu0 %v688_v20  ;;  %p699_p1 = pnand %p698_p0, %p840_p5  ;;  %p705_p4 = scmp.lt.s32.totalorder %s703_s7, %s697_s30 }
  0x30   : > { %612 = vmatprep.subr.bf16.mxu0 %v777_v16 }
  0x31   : > { %p700_p2 = pneg %p699_p1  ;;  %p706_p6 = por %p705_p4, %p704_p3 }
  0x33   : > { %613 = vmatpush3.bf16.msra.mxu0 %v689_v21  ;;  %p707_p7 = pnand %p706_p6, %p700_p2 }
  0x34   : > { %614 = vmatprep.subr.bf16.mxu0 %v777_v16 }
  0x37   : > { %615 = vmatpush3.bf16.msra.mxu0 %v690_v22 }
  0x38   : > { %616 = vmatprep.subr.bf16.mxu0 %v777_v16 }
  0x3b   : > { %617 = vmatpush3.bf16.msra.mxu0 %v691_v23 }
  0x3c   : > { %618 = vmatprep.subr.bf16.mxu0 %v777_v16 }
  0x3f   : > { %619 = vmatpush3.bf16.msra.mxu0 %v692_v24 }
  0x40   : > { %620 = vmatprep.subr.bf16.mxu0 %v777_v16 }
  0x43   : > { %621 = vmatpush3.bf16.msra.mxu0 %v693_v25 }
  0x44   : > { %622 = vmatprep.subr.bf16.mxu0 %v777_v16 }
  0x47   : > { %623 = vmatpush3.bf16.msra.mxu0 %v694_v26 }
  0x4a   : > { %625 = vmatmul.mubr.bf16.vlgmr.msra.gmra.mrb[0].mxu0 %v319_v27 }
  0xa9   : > { %v448_v43 = vpop.permute.xlu0 %447 }
  0xaa   : > { %vm449_vm3 = vcmp.eq.s32.totalorder %v444_v42, %v448_v43 }
 0x11d   : > { %v418_v28 = vpop.f32.mrb[0].mxu0 }
 0x11e   : > { %v424_v29 = vmul.f32 %v418_v28, %v418_v28  ;;  %v626_v30 = vpop.f32.mrb[1].mxu0  ;;  %v434_v45 = vmul.f32 0.87758255, %v418_v28  ;;  %v593_v47 = vadd.f32 -0.23971277, %v418_v28 }
 0x11f   : > { %v421_v31 = vpop.f32.mrb[2].mxu0  ;;  %vm437_vm4 = vcmp.gt.f32.partialorder %v418_v28, -0.87758255 }
 0x120   : > { %v425_v32 = vsub.f32 1.0, %v424_v29  ;;  %v627_v33 = vpop.f32.mrb[3].mxu0 }
 0x122   : > { %v426_v34 = vmax.f32 %v425_v32, 0.0 }
 0x124   : > { %695 = vrsqrt.f32 %v426_v34  ;;  %vm429_vm1 = vcmp.eq.f32.partialorder %v426_v34, inf  ;;  %v432_v40 = vand.u32 2147483648, %v426_v34  ;;  %vm431_vm2 = vcmp.eq.f32.partialorder %v426_v34, 0.0 }
 0x12e   : > { %v696_v37 = vpop.eup %695 }
 0x12f   : > { %v428_v39 = vmul.f32 %v696_v37, %v426_v34 }
 0x131   : > { %v430_v41 = vsel %vm429_vm1, %v426_v34, %v428_v39 }
 0x132   : > { %v433_v44 = vsel %vm431_vm2, %v432_v40, %v430_v41 }
 0x133   : > { %v435_v46 = vmul.f32 0.47942555, %v433_v44 }
 0x135   : > { %v436_v48 = vsub.f32 %v434_v45, %v435_v46 }
 0x137   : > { %v439_v49 = vsel %vm437_vm4, %v436_v48, %v593_v47 }
 0x138   : > { %v450_v50 = vsel %vm449_vm3, %v439_v49, %v418_v28 }
 0x139   : > { %v451_v51 = vmul.f32 30.0, %v450_v50 }
 0x13b   : > { %452 = vst [vmem:[%s309_s15] sm:$0xff] %v451_v51 }
 0x13c   : > { %710 = shalt.err (!%p707_p7)
}
 0x13d   : > { %s711_s6 = scalar_lea.hbm %s896_s28, 128  ;;  %s715_s10 = scalar_lea.hbm %s947_s3, 512 }
 0x13e   : > { %p712_p8 = scmp.ne.s32.totalorder %s896_s28, %s711_s6  ;;  %p716_p12 = scmp.lt.u32.totalorder %s896_s28, %s947_s3 }
 0x13f   : > { %p717_p13 = scmp.lt.u32.totalorder %s715_s10, %s711_s6  ;;  %p719_p1 = scmp.lt.u32.totalorder %s711_s6, %s896_s28 }
 0x140   : > { %p713_p10 = pnand %p712_p8, %p840_p5 }
 0x141   : > { %p718_p0 = por %p717_p13, %p716_p12 }
 0x142   : > { %p714_p11 = pneg %p713_p10 }
 0x143   : > { %p720_p2 = por %p719_p1, %p718_p0 }
 0x145   : > { %p721_p3 = pnand %p720_p2, %p714_p11 }
 0x147   : > { %724 = shalt.err (!%p721_p3)
}
 0x148   : > { %628 = dma.vmem_to_hbm [thread:$0]  (%p840_p5), %s898_s23, 128, %s896_s28, %s454_s29  }
 0x149 PF: > { %p634_p4 = scmp.ge.s32.totalorder %s775_s17, 2  ;;  %s481_s19 = sand.u32 1, %s755_s12  }
 0x14a   : > { %s482_s21 = scalar_lea.sflag [#allocation4], %s481_s19 }
 0x14b   : > { %p631_p6 = pnand %p634_p4, %p851_p9 }
 0x14d   : > { %750 = dma.done.wait (!%p631_p6), %s482_s21, 128  }
 0x14e   : > { %752 = vsyncadd (!%p631_p6), %s482_s21, 4294967168  ;;  %s16_s17 = sadd.s32 1, %s775_s17   ;;  %s950_s12 = smov %s759_s13 }
 0x14f   : > { %p13_p7 = scmp.ge.s32.totalorder %s16_s17, 6   ;;  %s951_s13 = smov %s763_s14 }
 0x150   : > { %s952_s14 = smov %s849_s24  ;;  %s953_s15 = smov %s771_s16 }
 0x151   : > { %s954_s16 = smov %s956_s20  ;;  %15 = sbr.rel (!%p13_p7) target bundleno = 4 (0x4), region = 119 }
 0x158   :  { %487 = vsyncpa [#allocation4], 1 }
 0x159   :  { %489 = vsyncpa [#allocation4 + $0x1], 1 }

</bundles_post_ra>
